<compile_context>
chip_gen: v7x
topology: tpu7x:2x2x1
jax: 0.10.0
libtpu: 0.0.40
codegen_flags: <defaults>
</compile_context>

<pallas_src>
import functools

import jax
import jax.numpy as jnp
from jax import lax
from jax.experimental import pallas as pl
from jax.experimental.pallas import tpu as pltpu

FUZZY_FACTOR = 2
REG_WT = 0.0008


def _round_up(x, m):
    return ((x + m - 1) // m) * m


def _pick_tb(B, per_image_bytes, budget=1 << 20):
    """Largest divisor of B whose pred block stays under `budget` bytes."""
    max_tb = max(1, budget // max(int(per_image_bytes), 1))
    tb = 1
    for cand in range(1, B + 1):
        if B % cand == 0 and cand <= max_tb:
            tb = cand
    return tb


def _vmem_limit_bytes():
    """Generation-aware VMEM scoped limit with a conservative fallback."""
    try:
        cap = int(pltpu.get_tpu_info().vmem_capacity_bytes)
    except Exception:
        cap = 64 * 1024 * 1024  # v7x physical VMEM -> safe everywhere
    return int(min(int(cap * 0.75), 100 * 1024 * 1024))


def _rfcm_kernel(pred_ref, img_ref, g_ref, s_sel_ref, out_ref,
                 *, TB, Hp, Wp, C, fuzzy_factor):
    """Partial sums of J1 (variance) and J2 (regulariser) for TB images.

    pred_ref : (TB, Hp, C*Wp) channel-packed, zero-padded softmax probabilities
    img_ref  : (TB, Hp, Wp)   zero-padded input image
    g_ref    : (C*Wp, Wp)     0/1 packed -> per-pixel channel-sum matrix
    s_sel_ref: (C*Wp, C)      0/1 packed -> per-channel scalar-sum matrix
    out_ref  : (1, 8, 128)    row 0 = J1 partial, row 1 = J2 partial (f32)
    """
    f32 = jnp.float32
    CWp = C * Wp
    R = TB * Hp  # Hp is a multiple of 8 -> merging (TB, Hp) is layout-free.

    pred = pred_ref[...].astype(f32).reshape(R, CWp)
    img = img_ref[...].astype(f32).reshape(R, Wp)

    if fuzzy_factor == 2:
        mem = pred * pred                      # fast VPU path (default exponent)
    elif float(fuzzy_factor).is_integer() and fuzzy_factor >= 1:
        mem = pred ** int(fuzzy_factor)        # repeated multiplies, no EUP pow
    else:
        # TODO(synk): non-integer fuzzy_factor lowers to per-pixel exp/log (EUP).
        mem = pred ** fuzzy_factor

    # ---- 3x3 ones-with-zero-centre stencil = (vertical 3-tap) o (horizontal
    # 3-tap) - centre.  Both taps are zero-filled +-1 neighbour shifts; the zero
    # pad column after each channel and the zero pad rows after each image
    # (inserted by the wrapper) make the taps correct at every boundary.
    zc = jnp.zeros_like(mem[:, :1])            # (R, 1) zero lane column
    h3 = mem
    h3 = h3 + jnp.concatenate([zc, mem[:, :-1]], axis=1)   # left neighbour
    h3 = h3 + jnp.concatenate([mem[:, 1:], zc], axis=1)    # right neighbour
    zr = jnp.zeros_like(h3[:1, :])             # (1, CWp) zero sublane row
    v3 = h3
    v3 = v3 + jnp.concatenate([zr, h3[:-1, :]], axis=0)    # up neighbour
    v3 = v3 + jnp.concatenate([h3[1:, :], zr], axis=0)     # down neighbour
    conv_zc = v3 - mem                         # zero-centre conv, per channel

    dot = functools.partial(jnp.dot, preferred_element_type=f32)
    g = g_ref[...]                             # (CWp, Wp)
    s_sel = s_sel_ref[...]                     # (CWp, C)

    # ---- J2: neighbourhood regulariser via linearity (sum_{j!=i} = all - self)
    m_sum = dot(mem, g)                        # (R, Wp)  sum_i mem_i per pixel
    conv_all = dot(conv_zc, g)                 # (R, Wp)  sum_j conv(mem_j)
    j2 = jnp.sum(m_sum * conv_all) - jnp.sum(mem * conv_zc)

    # ---- J1: fuzzy within-cluster variance, expanded form:
    #   J1 = sum(m_sum * img^2) - sum_{image, cluster} s^2 / d
    #   with d = sum(mem_c) and s = sum(img * mem_c) per image.
    img_t = jnp.concatenate([img] * C, axis=1)               # (R, CWp) tiled image
    red = jnp.concatenate(
        [jnp.sum(mem.reshape(TB, Hp, CWp), axis=1),           # per-image sum(mem)
         jnp.sum((img_t * mem).reshape(TB, Hp, CWp), axis=1)],  # per-image sum(img*mem)
        axis=0)                                               # (2*TB, CWp)
    ds = dot(red, s_sel)                                      # (2*TB, C) fused d|s
    d = ds[:TB, :]
    s = ds[TB:, :]
    j1 = jnp.sum(m_sum * (img * img)) - jnp.sum((s * s) / d)

    # ---- single lane-dense output block: row 0 = j1, rows 1.. = j2
    row = lax.broadcasted_iota(jnp.int32, out_ref.shape, 1)
    out_ref[...] = jnp.where(row == 0, j1, j2).astype(f32)


@functools.partial(jax.jit, static_argnames=("fuzzy_factor", "regularizer_wt"))
def rfcm_loss(y_pred, image, fuzzy_factor=FUZZY_FACTOR, regularizer_wt=REG_WT):
    """2D RFCM loss. y_pred: (B, C, H, W) softmax probs; image: (B, 1, H, W)."""
    # TODO(synk): the 3D (F.conv3d) branch of the original module is not implemented.
    assert y_pred.ndim == 4, "Pallas RFCM loss supports 2D inputs (B, C, H, W) only."
    B, C, H, W = y_pred.shape

    # Packed, zero-padded layout (layout plumbing done by XLA outside the kernel):
    #   * one zero column after each channel's W pixels -> horizontal tap never
    #     leaks across packed channels (and never wraps into real data);
    #   * >=1 zero row after each image's H rows, rounded so every image spans a
    #     multiple of 8 sublanes -> vertical tap never leaks across the TB images
    #     merged into one grid step, and in-kernel reshapes stay layout-free.
    Wp = W + 1
    Hp = _round_up(H + 1, 8)
    CWp = C * Wp

    pred_pad = jnp.pad(y_pred, ((0, 0), (0, 0), (0, Hp - H), (0, Wp - W)))
    pred_p = jnp.transpose(pred_pad, (0, 2, 1, 3)).reshape(B, Hp, CWp)
    img_p = jnp.pad(image.reshape(B, H, W), ((0, 0), (0, Hp - H), (0, Wp - W)))

    # Constant 0/1 selection matrices: built once here (hoisted out of the kernel
    # body) and fetched once thanks to the constant index_map below.
    p_idx = jnp.arange(CWp, dtype=jnp.int32)
    g = (p_idx[:, None] % Wp ==
         jnp.arange(Wp, dtype=jnp.int32)[None, :]).astype(jnp.float32)
    s_sel = (p_idx[:, None] // Wp ==
             jnp.arange(C, dtype=jnp.int32)[None, :]).astype(jnp.float32)

    # Several images per grid step (TB divides B -> no all-zero padded images ever
    # reach the centroid division).  On v7x, grid steps > 1 also give the second
    # TensorCore work via dimension_semantics=("parallel",).
    TB = _pick_tb(B, Hp * CWp * y_pred.dtype.itemsize)
    G = B // TB

    kernel = functools.partial(
        _rfcm_kernel, TB=TB, Hp=Hp, Wp=Wp, C=C, fuzzy_factor=fuzzy_factor)

    out = pl.pallas_call(
        kernel,
        grid=(G,),
        in_specs=[
            pl.BlockSpec((TB, Hp, CWp), lambda b: (b, 0, 0)),
            pl.BlockSpec((TB, Hp, Wp), lambda b: (b, 0, 0)),
            pl.BlockSpec((CWp, Wp), lambda b: (0, 0)),   # fetched once, VMEM-resident
            pl.BlockSpec((CWp, C), lambda b: (0, 0)),    # fetched once, VMEM-resident
        ],
        out_specs=pl.BlockSpec((1, 8, 128), lambda b: (b, 0, 0)),
        out_shape=jax.ShapeDtypeStruct((G, 8, 128), jnp.float32),
        compiler_params=pltpu.CompilerParams(
            dimension_semantics=("parallel",),
            vmem_limit_bytes=_vmem_limit_bytes(),
        ),
    )(pred_p, img_p, g, s_sel)

    n = float(B * H * W)  # torch.mean over the accumulated (B, H*W) maps
    j1 = jnp.sum(out[:, 0, 0])
    j2 = jnp.sum(out[:, 1, 0])
    return j1 / n + regularizer_wt * (j2 / n)


def rfcm_loss_ref(y_pred, image, fuzzy_factor=FUZZY_FACTOR, wt=REG_WT):
    """Pure-JAX reference mirroring the PyTorch forward (pad-based conv)."""
    B, C, H, W = y_pred.shape
    pred = y_pred.reshape(B, C, H * W).astype(jnp.float32)
    img = image.reshape(B, H * W).astype(jnp.float32)

    def conv(m3d):  # (B, H, W) -> (B, H, W), 3x3 ones w/ zero centre, zero pad
        p = jnp.pad(m3d, ((0, 0), (1, 1), (1, 1)))
        s = jnp.zeros_like(m3d)
        for dh in (-1, 0, 1):
            for dw in (-1, 0, 1):
                if dh == 0 and dw == 0:
                    continue
                s = s + p[:, 1 + dh:1 + dh + H, 1 + dw:1 + dw + W]
        return s

    J1 = jnp.zeros((B, H * W), jnp.float32)
    J2 = jnp.zeros((B, H * W), jnp.float32)
    for i in range(C):
        mem = pred[:, i, :] ** fuzzy_factor
        v_k = jnp.sum(img * mem, axis=1, keepdims=True) / jnp.sum(
            mem, axis=1, keepdims=True)
        J1 = J1 + mem * (img - v_k) ** 2
        J_in = jnp.zeros((B, H * W), jnp.float32)
        for j in range(C):
            if i == j:
                continue
            mj = (pred[:, j, :] ** fuzzy_factor).reshape(B, H, W)
            J_in = J_in + conv(mj).reshape(B, H * W)
        J2 = J2 + mem * J_in
    return jnp.mean(J1) + wt * jnp.mean(J2)


if __name__ == "__main__":
    key = jax.random.PRNGKey(0)
    k1, k2 = jax.random.split(key)
    B, C, H, W = 2, 4, 16, 16
    # y_pred: softmax has already been applied (as stated in the module docs)
    logits = jax.random.normal(k1, (B, C, H, W), dtype=jnp.float32)
    y_pred = jax.nn.softmax(logits, axis=1)
    image = jax.random.normal(k2, (B, 1, H, W), dtype=jnp.float32)

    loss = jax.block_until_ready(rfcm_loss(y_pred, image))

    ref = rfcm_loss_ref(y_pred, image)
    assert jnp.allclose(loss, ref, rtol=1e-4, atol=1e-5), (loss, ref)

    print("KERNEL_OK")
</pallas_src>

<mosaic_0001>
module attributes {stable_mosaic.version = 11 : i64} {
  func.func @_rfcm_kernel(%arg0: i32, %arg1: memref<2x24x68xf32, #tpu.memory_space<vmem>>, %arg2: memref<2x24x17xf32, #tpu.memory_space<vmem>>, %arg3: memref<68x17xf32, #tpu.memory_space<vmem>>, %arg4: memref<68x4xf32, #tpu.memory_space<vmem>>, %arg5: memref<1x8x128xf32, #tpu.memory_space<vmem>>) attributes {dimension_semantics = [#tpu.dimension_semantics<parallel>], iteration_bounds = array<i64: 1>, scalar_prefetch = 0 : i64, scratch_operands = 0 : i64, tpu.core_type = #tpu.core_type<tc>, window_params = [{transform_indices = @transform_0, window_bounds = array<i64: 2, 24, 68>}, {transform_indices = @transform_1, window_bounds = array<i64: 2, 24, 17>}, {pipeline_mode = #tpu.pipeline_mode<synchronous>, transform_indices = @transform_2, window_bounds = array<i64: 68, 17>}, {pipeline_mode = #tpu.pipeline_mode<synchronous>, transform_indices = @transform_3, window_bounds = array<i64: 68, 4>}, {transform_indices = @transform_4, window_bounds = array<i64: 1, 8, 128>}]} {
    %c0 = arith.constant 0 : index
    %c0_0 = arith.constant 0 : index
    %c0_1 = arith.constant 0 : index
    %0 = vector.load %arg1[%c0, %c0_0, %c0_1] : memref<2x24x68xf32, #tpu.memory_space<vmem>>, vector<2x24x68xf32>
    %1 = vector.shape_cast %0 : vector<2x24x68xf32> to vector<48x68xf32>
    %c0_2 = arith.constant 0 : index
    %c0_3 = arith.constant 0 : index
    %c0_4 = arith.constant 0 : index
    %2 = vector.load %arg2[%c0_2, %c0_3, %c0_4] : memref<2x24x17xf32, #tpu.memory_space<vmem>>, vector<2x24x17xf32>
    %3 = vector.shape_cast %2 : vector<2x24x17xf32> to vector<48x17xf32>
    %4 = arith.mulf %1, %1 : vector<48x68xf32>
    %cst = arith.constant 0.000000e+00 : f32
    %5 = vector.broadcast %cst : f32 to vector<48x1xf32>
    %6 = vector.extract_strided_slice %4 {offsets = [0, 0], sizes = [48, 67], strides = [1, 1]} : vector<48x68xf32> to vector<48x67xf32>
    %7 = tpu.concatenate %5, %6 in 1 : vector<48x1xf32>, vector<48x67xf32> -> vector<48x68xf32>
    %8 = arith.addf %4, %7 : vector<48x68xf32>
    %9 = vector.extract_strided_slice %4 {offsets = [0, 1], sizes = [48, 67], strides = [1, 1]} : vector<48x68xf32> to vector<48x67xf32>
    %10 = tpu.concatenate %9, %5 in 1 : vector<48x67xf32>, vector<48x1xf32> -> vector<48x68xf32>
    %11 = arith.addf %8, %10 : vector<48x68xf32>
    %cst_5 = arith.constant 0.000000e+00 : f32
    %12 = vector.broadcast %cst_5 : f32 to vector<1x68xf32>
    %13 = vector.extract_strided_slice %11 {offsets = [0, 0], sizes = [47, 68], strides = [1, 1]} : vector<48x68xf32> to vector<47x68xf32>
    %14 = tpu.concatenate %12, %13 in 0 : vector<1x68xf32>, vector<47x68xf32> -> vector<48x68xf32>
    %15 = arith.addf %11, %14 : vector<48x68xf32>
    %16 = vector.extract_strided_slice %11 {offsets = [1, 0], sizes = [47, 68], strides = [1, 1]} : vector<48x68xf32> to vector<47x68xf32>
    %17 = tpu.concatenate %16, %12 in 0 : vector<47x68xf32>, vector<1x68xf32> -> vector<48x68xf32>
    %18 = arith.addf %15, %17 : vector<48x68xf32>
    %19 = arith.subf %18, %4 : vector<48x68xf32>
    %c0_6 = arith.constant 0 : index
    %c0_7 = arith.constant 0 : index
    %20 = vector.load %arg3[%c0_6, %c0_7] : memref<68x17xf32, #tpu.memory_space<vmem>>, vector<68x17xf32>
    %c0_8 = arith.constant 0 : index
    %c0_9 = arith.constant 0 : index
    %21 = vector.load %arg4[%c0_8, %c0_9] : memref<68x4xf32, #tpu.memory_space<vmem>>, vector<68x4xf32>
    %cst_10 = arith.constant dense<0.000000e+00> : vector<48x17xf32>
    %22 = tpu.matmul %4, %20, %cst_10 {dimension_numbers = #tpu.dot_dimension_numbers<[1], [0], [0], [1], [0, 0, 1, 1], [], []>} : vector<48x68xf32>, vector<68x17xf32>, vector<48x17xf32> -> vector<48x17xf32>
    %cst_11 = arith.constant dense<0.000000e+00> : vector<48x17xf32>
    %23 = tpu.matmul %19, %20, %cst_11 {dimension_numbers = #tpu.dot_dimension_numbers<[1], [0], [0], [1], [0, 0, 1, 1], [], []>} : vector<48x68xf32>, vector<68x17xf32>, vector<48x17xf32> -> vector<48x17xf32>
    %24 = arith.mulf %22, %23 : vector<48x17xf32>
    %25 = vector.shape_cast %24 : vector<48x17xf32> to vector<1x48x17xf32>
    %cst_12 = arith.constant dense<0.000000e+00> : vector<1xf32>
    %26 = vector.multi_reduction <add>, %25, %cst_12 [1, 2] : vector<1x48x17xf32> to vector<1xf32>
    %27 = vector.shape_cast %26 : vector<1xf32> to vector<1x1x1xf32>
    %28 = vector.extract %27[0, 0, 0] : f32 from vector<1x1x1xf32>
    %29 = arith.mulf %4, %19 : vector<48x68xf32>
    %30 = vector.shape_cast %29 : vector<48x68xf32> to vector<1x48x68xf32>
    %cst_13 = arith.constant dense<0.000000e+00> : vector<1xf32>
    %31 = vector.multi_reduction <add>, %30, %cst_13 [1, 2] : vector<1x48x68xf32> to vector<1xf32>
    %32 = vector.shape_cast %31 : vector<1xf32> to vector<1x1x1xf32>
    %33 = vector.extract %32[0, 0, 0] : f32 from vector<1x1x1xf32>
    %34 = arith.subf %28, %33 : f32
    %35 = tpu.concatenate %3, %3, %3, %3 in 1 : vector<48x17xf32>, vector<48x17xf32>, vector<48x17xf32>, vector<48x17xf32> -> vector<48x68xf32>
    %36 = vector.shape_cast %4 : vector<48x68xf32> to vector<2x24x68xf32>
    %cst_14 = arith.constant dense<0.000000e+00> : vector<2x68xf32>
    %37 = vector.multi_reduction <add>, %36, %cst_14 [1] : vector<2x24x68xf32> to vector<2x68xf32>
    %38 = arith.mulf %35, %4 : vector<48x68xf32>
    %39 = vector.shape_cast %38 : vector<48x68xf32> to vector<2x24x68xf32>
    %cst_15 = arith.constant dense<0.000000e+00> : vector<2x68xf32>
    %40 = vector.multi_reduction <add>, %39, %cst_15 [1] : vector<2x24x68xf32> to vector<2x68xf32>
    %41 = tpu.concatenate %37, %40 in 0 : vector<2x68xf32>, vector<2x68xf32> -> vector<4x68xf32>
    %cst_16 = arith.constant dense<0.000000e+00> : vector<4x4xf32>
    %42 = tpu.matmul %41, %21, %cst_16 {dimension_numbers = #tpu.dot_dimension_numbers<[1], [0], [0], [1], [0, 0, 1, 1], [], []>} : vector<4x68xf32>, vector<68x4xf32>, vector<4x4xf32> -> vector<4x4xf32>
    %43 = vector.extract_strided_slice %42 {offsets = [0, 0], sizes = [2, 4], strides = [1, 1]} : vector<4x4xf32> to vector<2x4xf32>
    %44 = vector.extract_strided_slice %42 {offsets = [2, 0], sizes = [2, 4], strides = [1, 1]} : vector<4x4xf32> to vector<2x4xf32>
    %45 = arith.mulf %3, %3 : vector<48x17xf32>
    %46 = arith.mulf %22, %45 : vector<48x17xf32>
    %47 = vector.shape_cast %46 : vector<48x17xf32> to vector<1x48x17xf32>
    %cst_17 = arith.constant dense<0.000000e+00> : vector<1xf32>
    %48 = vector.multi_reduction <add>, %47, %cst_17 [1, 2] : vector<1x48x17xf32> to vector<1xf32>
    %49 = vector.shape_cast %48 : vector<1xf32> to vector<1x1x1xf32>
    %50 = vector.extract %49[0, 0, 0] : f32 from vector<1x1x1xf32>
    %51 = arith.mulf %44, %44 : vector<2x4xf32>
    %52 = arith.divf %51, %43 : vector<2x4xf32>
    %53 = vector.shape_cast %52 : vector<2x4xf32> to vector<1x2x4xf32>
    %cst_18 = arith.constant dense<0.000000e+00> : vector<1xf32>
    %54 = vector.multi_reduction <add>, %53, %cst_18 [1, 2] : vector<1x2x4xf32> to vector<1xf32>
    %55 = vector.shape_cast %54 : vector<1xf32> to vector<1x1x1xf32>
    %56 = vector.extract %55[0, 0, 0] : f32 from vector<1x1x1xf32>
    %57 = arith.subf %50, %56 : f32
    %58 = tpu.iota {dimensions = array<i32: 1>} : vector<1x8x128xi32>
    %c0_i32 = arith.constant 0 : i32
    %59 = vector.broadcast %c0_i32 : i32 to vector<1x8x128xi32>
    %60 = arith.cmpi eq, %58, %59 : vector<1x8x128xi32>
    %61 = vector.broadcast %57 : f32 to vector<1x8x128xf32>
    %62 = vector.broadcast %34 : f32 to vector<1x8x128xf32>
    %63 = arith.select %60, %61, %62 : vector<1x8x128xi1>, vector<1x8x128xf32>
    %c0_19 = arith.constant 0 : index
    %c0_20 = arith.constant 0 : index
    %c0_21 = arith.constant 0 : index
    %64 = vector.load %arg5[%c0_19, %c0_20, %c0_21] : memref<1x8x128xf32, #tpu.memory_space<vmem>>, vector<1x8x128xf32>
    tpu.vector_store %arg5[%c0_19, %c0_20, %c0_21], %63 {strides = array<i32>} : memref<1x8x128xf32, #tpu.memory_space<vmem>>, vector<1x8x128xf32>,
    return
  }
  func.func @transform_0(%arg0: i32) -> (i32, i32, i32) {
    %c0_i32 = arith.constant 0 : i32
    %c0_i32_0 = arith.constant 0 : i32
    %c0_i32_1 = arith.constant 0 : i32
    return %arg0, %c0_i32, %c0_i32_0 : i32, i32, i32
  }
  func.func @transform_1(%arg0: i32) -> (i32, i32, i32) {
    %c0_i32 = arith.constant 0 : i32
    %c0_i32_0 = arith.constant 0 : i32
    %c0_i32_1 = arith.constant 0 : i32
    return %arg0, %c0_i32, %c0_i32_0 : i32, i32, i32
  }
  func.func @transform_2(%arg0: i32) -> (i32, i32) {
    %c0_i32 = arith.constant 0 : i32
    %c0_i32_0 = arith.constant 0 : i32
    %c0_i32_1 = arith.constant 0 : i32
    return %c0_i32, %c0_i32_0 : i32, i32
  }
  func.func @transform_3(%arg0: i32) -> (i32, i32) {
    %c0_i32 = arith.constant 0 : i32
    %c0_i32_0 = arith.constant 0 : i32
    %c0_i32_1 = arith.constant 0 : i32
    return %c0_i32, %c0_i32_0 : i32, i32
  }
  func.func @transform_4(%arg0: i32) -> (i32, i32, i32) {
    %c0_i32 = arith.constant 0 : i32
    %c0_i32_0 = arith.constant 0 : i32
    %c0_i32_1 = arith.constant 0 : i32
    return %arg0, %c0_i32, %c0_i32_0 : i32, i32, i32
  }
}

</mosaic_0001>

<bundles_post_ra>
// kernel: rfcm_loss.1
= control target key start
LH: loop header
LB: loop body
LE: loop exit
PB: predicated region body
PF: predicated region fallthrough
CT: control target
= control target key end

     0   :  { %s937_s19 = smov 17   ;;  %vm183_vm0 = vcmask 556032   ;;  %s938_s8 = smov 34   ;;  %vm196_vm1 = vcmask 1043456   ;;  %v940_v32 = vmov 0.0|0.0   ;;  %vm942_vm2 = vmmov 0   ;;  %s1281_s1 = inlined_call_operand.vmem [shape: f32[2,24,17], index: 1, kind: input, shape index: {}]   ;;  %s1282_s0 = inlined_call_operand.vmem [shape: f32[2,24,68], index: 0, kind: input, shape index: {}]   ;;  %s1283_s2 = inlined_call_operand.vmem [shape: f32[68,17], index: 2, kind: input, shape index: {}]   ;;  %s1284_s3 = inlined_call_operand.vmem [shape: f32[68,4], index: 3, kind: input, shape index: {}]   ;;  %s1285_s4 = inlined_call_operand.vmem [shape: f32[1,8,128], index: 4, kind: output, shape index: {}]  }
   0x1   :  { %v973_v0 = vld [vmem:[%s1281_s1 + $0x18] sm:$0xff]  ;;  %v978_v1 = vld [vmem:[%s1281_s1] sm:$0xff]  ;;  %v992_v3 = vld [vmem:[%s1281_s1 + $0x8] sm:$0xff]  ;;  %s939_s27 = smov 51   ;;  %v943_v44 = vmov 0.0   ;;  %s944_s24 = smov 127  }
   0x2   :  { %474 = vrot.lane.b32.xlu1 %v973_v0, %s937_s19  ;;  %468 = vrot.lane.b32.xlu0 %v978_v1, %s937_s19  ;;  %v987_v2 = vld [vmem:[%s1281_s1 + $0x20] sm:$0xff]  ;;  %v166_v7 = vld [vmem:[%s1283_s2 + $0x8] sm:$0xff]  ;;  %vm414_vm3 = vcmask 138240   ;;  %vm528_vm4 = vcmask 277504   ;;  %vm535_vm5 = vcmask 416768   ;;  %vm59_vm6 = vcmask 7168  }
   0x3   :  { %v17_v4 = vld [vmem:[%s1282_s0] sm:$0xff]  ;;  %v167_v9 = vld [vmem:[%s1283_s2 + $0x10] sm:$0xff]  ;;  %v168_v10 = vld [vmem:[%s1283_s2 + $0x18] sm:$0xff]  ;;  %vm90_vm7 = vcmask 547840   ;;  %vm109_vm8 = vcmask 1040384   ;;  %vm594_vm9 = vcmask 1041409  }
   0x4   :  { %v997_v5 = vmul.f32 %v17_v4, %v17_v4  ;;  %v165_v6 = vld [vmem:[%s1283_s2] sm:$0xff]  ;;  %v879_v11 = vpack.c.bf16 %v168_v10, %v167_v9  ;;  %v170_v13 = vld [vmem:[%s1283_s2 + $0x28] sm:$0xff]  ;;  %v171_v15 = vld [vmem:[%s1283_s2 + $0x30] sm:$0xff]  ;;  %vm134_vm10 = vcmask 1046528   ;;  %vm599_vm11 = vcmask 1043459  }
   0x5   :  { %v875_v8 = vpack.c.bf16 %v166_v7, %v165_v6  ;;  %v169_v12 = vld [vmem:[%s1283_s2 + $0x20] sm:$0xff]  ;;  %v172_v16 = vld [vmem:[%s1283_s2 + $0x38] sm:$0xff]  ;;  %v1040_v17 = vld [vmem:[%s1281_s1 + $0x28] sm:$0xff]  ;;  %vm602_vm12 = vcmask 1041408   ;;  %vm721_vm13 = vcmask 25600  }
   0x6   :  { %476 = vrot.lane.b32.xlu1 %v987_v2, %s937_s19  ;;  %470 = vrot.lane.b32.xlu0 %v992_v3, %s937_s19  ;;  %v883_v14 = vpack.c.bf16 %v170_v13, %v169_v12  ;;  %v1045_v18 = vld [vmem:[%s1281_s1 + $0x10] sm:$0xff]  ;;  %v887_v19 = vpack.c.bf16 %v172_v16, %v171_v15  ;;  %v173_v20 = vld [vmem:[%s1283_s2 + $0x40] sm:$0xf]  ;;  %v542_v52 = vsel %vm183_vm0, %v997_v5, 0.0 }
   0x7   :  { %818 = vmatprep.mubr.msk.f32.mxu0 %vm183_vm0, %v997_v5  ;;  %876 = vmatprep.subr.bf16.mxu0 %v875_v8  ;;  %v174_v21 = vld [vmem:[%s1284_s3] sm:$0xff]  ;;  %v175_v22 = vld [vmem:[%s1284_s3 + $0x8] sm:$0xff]  ;;  %v19_v24 = vld [vmem:[%s1282_s0 + $0x10] sm:$0xff] }
   0x8   :  { %892 = vmatprep.subr.bf16.mxu1 %v875_v8  ;;  %878 = vmatpush3.bf16.msra.mxu0 %v875_v8  ;;  %v18_v23 = vld [vmem:[%s1282_s0 + $0x8] sm:$0xff]  ;;  %v908_v25 = vpack.c.bf16 %v175_v22, %v174_v21  ;;  %v176_v27 = vld [vmem:[%s1284_s3 + $0x10] sm:$0xff]  ;;  %v177_v28 = vld [vmem:[%s1284_s3 + $0x18] sm:$0xff]  ;;  %v1086_v29 = vmul.f32 %v19_v24, %v19_v24 }
   0x9   :  { %894 = vmatpush3.bf16.msra.mxu1 %v875_v8  ;;  %880 = vmatprep.subr.bf16.mxu0 %v879_v11  ;;  %v1072_v26 = vmul.f32 %v18_v23, %v18_v23  ;;  %v20_v30 = vld [vmem:[%s1282_s0 + $0x18] sm:$0xff]  ;;  %v21_v31 = vld [vmem:[%s1282_s0 + $0x20] sm:$0xff]  ;;  %v911_v33 = vpack.c.bf16 %v177_v28, %v176_v27  ;;  %v179_v36 = vld [vmem:[%s1284_s3 + $0x28] sm:$0xff] }
   0xa   :  { %488 = vrot.lane.b32.xlu1 %v992_v3, %s938_s8  ;;  %486 = vrot.lane.b32.xlu0 %v978_v1, %s938_s8  ;;  %v1098_v34 = vmul.f32 %v20_v30, %v20_v30  ;;  %v178_v35 = vld [vmem:[%s1284_s3 + $0x20] sm:$0xff]  ;;  %v1110_v37 = vmul.f32 %v21_v31, %v21_v31  ;;  %v22_v38 = vld [vmem:[%s1282_s0 + $0x28] sm:$0xff]  ;;  %s941_s0 = smov 1   ;;  %v545_v60 = vsel %vm183_vm0, %v1086_v29, 0.0 }
   0xb   :  { %896 = vmatprep.subr.bf16.mxu1 %v879_v11  ;;  %v914_v39 = vpack.c.bf16 %v179_v36, %v178_v35  ;;  %v1119_v40 = vmul.f32 %v22_v38, %v22_v38  ;;  %v180_v41 = vld [vmem:[%s1284_s3 + $0x30] sm:$0xff]  ;;  %v181_v42 = vld [vmem:[%s1284_s3 + $0x38] sm:$0xff]  ;;  %v182_v45 = vld [vmem:[%s1284_s3 + $0x40] sm:$0xf]  ;;  %v543_v53 = vsel %vm183_vm0, %v1072_v26, 0.0 }
   0xc   :  { %882 = vmatpush3.bf16.msra.mxu0 %v879_v11  ;;  %v917_v43 = vpack.c.bf16 %v181_v42, %v180_v41  ;;  %v553_v54 = vsel %vm183_vm0, %v1098_v34, 0.0  ;;  %v554_v55 = vsel %vm183_vm0, %v1110_v37, 0.0  ;;  %v544_v58 = vadd.f32 %v543_v53, %v542_v52 }
   0xd   :  { %898 = vmatpush3.bf16.msra.mxu1 %v879_v11  ;;  %884 = vmatprep.subr.bf16.mxu0 %v883_v14  ;;  %v555_v59 = vadd.f32 %v554_v55, %v553_v54  ;;  %v556_v61 = vsel %vm183_vm0, %v1119_v40, 0.0 }
   0xe   :  { %494 = vrot.lane.b32.xlu1 %v987_v2, %s938_s8  ;;  %492 = vrot.lane.b32.xlu0 %v973_v0, %s938_s8  ;;  %v546_v4 = vadd.f32 %v545_v60, %v544_v58 }
   0xf   :  { %900 = vmatprep.subr.bf16.mxu1 %v883_v14  ;;  %v557_v6 = vadd.f32 %v556_v61, %v555_v59 }
  0x10   :  { %886 = vmatpush3.bf16.msra.mxu0 %v883_v14  ;;  %v547_v11 = vrot.slane %v546_v4, 4 }
  0x11   :  { %902 = vmatpush3.bf16.msra.mxu1 %v883_v14  ;;  %888 = vmatprep.subr.bf16.mxu0 %v887_v19  ;;  %v558_v12 = vrot.slane %v557_v6, 4 }
  0x12   :  { %478 = vrot.lane.b32.xlu1 %v1040_v17, %s937_s19  ;;  %472 = vrot.lane.b32.xlu0 %v1045_v18, %s937_s19  ;;  %v548_v28 = vadd.f32 %v547_v11, %v546_v4 }
  0x13   :  { %904 = vmatprep.subr.bf16.mxu1 %v887_v19  ;;  %v559_v30 = vadd.f32 %v558_v12, %v557_v6 }
  0x14   :  { %890 = vmatpush3.bf16.msra.mxu0 %v887_v19 }
  0x15   :  { %906 = vmatpush3.bf16.msra.mxu1 %v887_v19  ;;  %816 = vmatprep.subr.msk.mxu0 %vm196_vm1, %v173_v20  ;;  %v560_v41 = vrot.slane %v559_v30, 2 }
  0x16   :  { %506 = vrot.lane.b32.xlu1 %v992_v3, %s939_s27  ;;  %504 = vrot.lane.b32.xlu0 %v978_v1, %s939_s27 }
  0x17   :  { %843 = vmatprep.subr.msk.mxu1 %vm196_vm1, %v173_v20  ;;  %v561_v59 = vadd.f32 %v560_v41, %v559_v30 }
  0x18   :  { %817 = vmatpush3.msk.msra.mxu0 %vm196_vm1, %v173_v20 }
  0x19   :  { %844 = vmatpush3.msk.msra.mxu1 %vm196_vm1, %v173_v20  ;;  %907 = vmatprep.subr.bf16.mxu0 %v940_v32  ;;  %v562_v11 = vrot.slane %v561_v59, 1 }
  0x1a   :  { %512 = vrot.lane.b32.xlu1 %v987_v2, %s939_s27  ;;  %510 = vrot.lane.b32.xlu0 %v973_v0, %s939_s27 }
  0x1b   :  { %819 = vmatmul.mubr.msk.f32.vlgmr.msra.gmra.mrb[0].mxu0 %vm183_vm0, %v1072_v26 }
  0x1c   :  { %909 = vmatpush3.bf16.msra.mxu0 %v908_v25  ;;  %821 = vmatprep.mubr.msk.f32.mxu0 %vm183_vm0, %v1086_v29 }
  0x1d   :  { %910 = vmatprep.subr.bf16.mxu0 %v940_v32 }
  0x1e   :  { %496 = vrot.lane.b32.xlu1 %v1040_v17, %s938_s8  ;;  %490 = vrot.lane.b32.xlu0 %v1045_v18, %s938_s8 }
  0x1f   :  { %822 = vmatmul.mubr.msk.f32.gmra.mrb[2].mxu0 %vm183_vm0, %v1098_v34 }
  0x20   :  { %912 = vmatpush3.bf16.msra.mxu0 %v911_v33  ;;  %824 = vmatprep.mubr.msk.f32.mxu0 %vm183_vm0, %v1110_v37 }
  0x21   :  { %913 = vmatprep.subr.bf16.mxu0 %v940_v32 }
  0x22   :  { %514 = vrot.lane.b32.xlu1 %v1040_v17, %s939_s27  ;;  %508 = vrot.lane.b32.xlu0 %v1045_v18, %s939_s27 }
  0x23   :  { %825 = vmatmul.mubr.msk.f32.gmra.mrb[4].mxu0 %vm183_vm0, %v1119_v40 }
  0x24   :  { %915 = vmatpush3.bf16.msra.mxu0 %v914_v39  ;;  %872 = vmatprep.mubr.msk.f32.mxu0 %vm942_vm2, %v943_v44  ;;  %v549_v39 = vrot.slane %v548_v28, 2 }
  0x25   :  { %916 = vmatprep.subr.bf16.mxu0 %v940_v32 }
  0x26   :  { %43 = vrot.lane.b32.xlu1 %v1072_v26, %s941_s0  ;;  %41 = vrot.lane.b32.xlu0 %v997_v5, %s941_s0  ;;  %v550_v58 = vadd.f32 %v549_v39, %v548_v28 }
  0x28   :  { %918 = vmatpush3.bf16.msra.mxu0 %v917_v43 }
  0x29   :  { %870 = vmatprep.subr.mxu0 %v943_v44 }
  0x2a   :  { %45 = vrot.lane.b32.xlu1 %v1086_v29, %s941_s0  ;;  %72 = vrot.lane.b32.xlu0 %v997_v5, %s944_s24 }
  0x2c   :  { %871 = vmatpush3.msk.msra.mxu0 %vm196_vm1, %v182_v45 }
  0x2e   :  { %47 = vrot.lane.b32.xlu1 %v1098_v34, %s941_s0  ;;  %74 = vrot.lane.b32.xlu0 %v1072_v26, %s944_s24 }
  0x32   :  { %49 = vrot.lane.b32.xlu1 %v1110_v37, %s941_s0  ;;  %76 = vrot.lane.b32.xlu0 %v1086_v29, %s944_s24 }
  0x36   :  { %51 = vrot.lane.b32.xlu1 %v1119_v40, %s941_s0  ;;  %78 = vrot.lane.b32.xlu0 %v1098_v34, %s944_s24 }
  0x3a   :  { %82 = vrot.lane.b32.xlu1 %v1119_v40, %s944_s24  ;;  %80 = vrot.lane.b32.xlu0 %v1110_v37, %s944_s24 }
  0x74   :  { %v475_v46 = vpop.permute.xlu1 %474  ;;  %v469_v47 = vpop.permute.xlu0 %468 }
  0x75   :  { %v522_v9 = vsel %vm414_vm3, %v978_v1, %v469_v47  ;;  %v525_v13 = vsel %vm414_vm3, %v973_v0, %v475_v46 }
  0x78   :  { %v477_v48 = vpop.permute.xlu1 %476  ;;  %v471_v49 = vpop.permute.xlu0 %470 }
  0x79   :  { %v523_v10 = vsel %vm414_vm3, %v992_v3, %v471_v49  ;;  %v526_v14 = vsel %vm414_vm3, %v987_v2, %v477_v48 }
  0x7c   :  { %v489_v50 = vpop.permute.xlu1 %488  ;;  %v487_v51 = vpop.permute.xlu0 %486 }
  0x7d   :  { %v530_v15 = vsel %vm528_vm4, %v523_v10, %v489_v50  ;;  %v529_v16 = vsel %vm528_vm4, %v522_v9, %v487_v51  ;;  %v551_v10 = vrot.slane %v550_v58, 1 }
  0x80   :  { %v495_v56 = vpop.permute.xlu1 %494  ;;  %v493_v57 = vpop.permute.xlu0 %492 }
  0x81   :  { %v533_v19 = vsel %vm528_vm4, %v526_v14, %v495_v56  ;;  %v532_v20 = vsel %vm528_vm4, %v525_v13, %v493_v57 }
  0x84   :  { %v479_v62 = vpop.permute.xlu1 %478  ;;  %v473_v63 = vpop.permute.xlu0 %472 }
  0x85   :  { %v527_v42 = vsel %vm414_vm3, %v1040_v17, %v479_v62  ;;  %v524_v43 = vsel %vm414_vm3, %v1045_v18, %v473_v63 }
  0x88   :  { %v507_v7 = vpop.permute.xlu1 %506  ;;  %v505_v8 = vpop.permute.xlu0 %504 }
  0x89   :  { %v537_v21 = vsel %vm535_vm5, %v530_v15, %v507_v7  ;;  %v536_v22 = vsel %vm535_vm5, %v529_v16, %v505_v8 }
  0x8a   :  { %v565_v31 = vmul.f32 %v537_v21, %v1072_v26  ;;  %v564_v32 = vmul.f32 %v536_v22, %v997_v5 }
  0x8c   :  { %v513_v23 = vpop.permute.xlu1 %512  ;;  %v511_v24 = vpop.permute.xlu0 %510  ;;  %v571_v44 = vsel %vm183_vm0, %v565_v31, 0.0  ;;  %v570_v45 = vsel %vm183_vm0, %v564_v32, 0.0 }
  0x8d   :  { %v540_v25 = vsel %vm535_vm5, %v533_v19, %v513_v23  ;;  %v539_v27 = vsel %vm535_vm5, %v532_v20, %v511_v24  ;;  %v572_v56 = vadd.f32 %v571_v44, %v570_v45  ;;  %v552_v24 = vadd.f32 %v551_v10, %v550_v58 }
  0x8e   :  { %v568_v33 = vmul.f32 %v540_v25, %v1110_v37  ;;  %v567_v35 = vmul.f32 %v539_v27, %v1098_v34  ;;  %v563_v25 = vadd.f32 %v562_v11, %v561_v59 }
  0x90   :  { %v497_v36 = vpop.permute.xlu1 %496  ;;  %v491_v38 = vpop.permute.xlu0 %490  ;;  %v582_v46 = vsel %vm183_vm0, %v568_v33, 0.0  ;;  %v581_v47 = vsel %vm183_vm0, %v567_v35, 0.0  ;;  %v595_v44 = vsel %vm594_vm9, %v563_v25, %v552_v24 }
  0x91   :  { %v534_v48 = vsel %vm528_vm4, %v527_v42, %v497_v36  ;;  %v531_v49 = vsel %vm528_vm4, %v524_v43, %v491_v38  ;;  %v583_v57 = vadd.f32 %v582_v46, %v581_v47 }
  0x94   :  { %v515_v50 = vpop.permute.xlu1 %514  ;;  %v509_v51 = vpop.permute.xlu0 %508 }
  0x95   :  { %v541_v52 = vsel %vm535_vm5, %v534_v48, %v515_v50  ;;  %v538_v53 = vsel %vm535_vm5, %v531_v49, %v509_v51 }
  0x96   :  { %v569_v54 = vmul.f32 %v541_v52, %v1119_v40  ;;  %v566_v55 = vmul.f32 %v538_v53, %v1086_v29 }
  0x98   :  { %v584_v60 = vsel %vm183_vm0, %v569_v54, 0.0  ;;  %v573_v61 = vsel %vm183_vm0, %v566_v55, 0.0  ;;  %v44_v62 = vpop.permute.xlu1 %43  ;;  %v42_v63 = vpop.permute.xlu0 %41 }
  0x99   :  { %v585_v4 = vadd.f32 %v584_v60, %v583_v57  ;;  %v574_v6 = vadd.f32 %v573_v61, %v572_v56  ;;  %v60_v7 = vsel %vm59_vm6, 0.0, %v42_v63  ;;  %v61_v19 = vsel %vm59_vm6, 0.0, %v44_v62 }
  0x9a   :  { %v66_v12 = vadd.f32 %v60_v7, %v997_v5  ;;  %v67_v27 = vadd.f32 %v61_v19, %v1072_v26 }
  0x9b   :  { %v586_v8 = vrot.slane %v585_v4, 4  ;;  %v575_v9 = vrot.slane %v574_v6, 4 }
  0x9c   :  { %v46_v13 = vpop.permute.xlu1 %45  ;;  %v73_v14 = vpop.permute.xlu0 %72 }
  0x9d   :  { %v587_v15 = vadd.f32 %v586_v8, %v585_v4  ;;  %v576_v16 = vadd.f32 %v575_v9, %v574_v6  ;;  %v91_v20 = vsel %vm90_vm7, %v73_v14, 0.0  ;;  %v62_v28 = vsel %vm59_vm6, 0.0, %v46_v13 }
  0x9e   :  { %v97_v21 = vadd.f32 %v91_v20, %v66_v12  ;;  %v68_v43 = vadd.f32 %v62_v28, %v1086_v29 }
  0x9f   :  { %v588_v22 = vrot.slane %v587_v15, 2  ;;  %v577_v23 = vrot.slane %v576_v16, 2 }
  0xa0   :  { %v110_v30 = vrot.slane %v97_v21, 7  ;;  %v48_v31 = vpop.permute.xlu1 %47  ;;  %v75_v32 = vpop.permute.xlu0 %74  ;;  %v135_v45 = vrot.slane %v97_v21, 1 }
  0xa1   :  { %v589_v33 = vadd.f32 %v588_v22, %v587_v15  ;;  %v578_v35 = vadd.f32 %v577_v23, %v576_v16  ;;  %v92_v36 = vsel %vm90_vm7, %v75_v32, 0.0  ;;  %v63_v46 = vsel %vm59_vm6, 0.0, %v48_v31 }
  0xa2   :  { %v98_v38 = vadd.f32 %v92_v36, %v67_v27  ;;  %v127_v39 = vsel %vm109_vm8, 0.0, %v110_v30  ;;  %v69_v58 = vadd.f32 %v63_v46, %v1098_v34 }
  0xa3   :  { %v590_v41 = vrot.slane %v589_v33, 1  ;;  %v579_v42 = vrot.slane %v578_v35, 1  ;;  %v128_v54 = vadd.f32 %v127_v39, %v97_v21 }
  0xa4   :  { %v111_v47 = vrot.slane %v98_v38, 7  ;;  %v136_v48 = vrot.slane %v98_v38, 1  ;;  %v50_v49 = vpop.permute.xlu1 %49  ;;  %v77_v50 = vpop.permute.xlu0 %76 }
  0xa5   :  { %v591_v51 = vadd.f32 %v590_v41, %v589_v33  ;;  %v580_v52 = vadd.f32 %v579_v42, %v578_v35  ;;  %v93_v53 = vsel %vm90_vm7, %v77_v50, 0.0  ;;  %v64_v61 = vsel %vm59_vm6, 0.0, %v50_v49 }
  0xa6   :  { %v112_v55 = vsel %vm109_vm8, %v110_v30, %v111_v47  ;;  %v99_v56 = vadd.f32 %v93_v53, %v68_v43  ;;  %v137_v57 = vsel %vm134_vm10, %v135_v45, %v136_v48  ;;  %v70_v19 = vadd.f32 %v64_v61, %v1110_v37 }
  0xa7   :  { %v600_v59 = vsel %vm599_vm11, %v591_v51, %v580_v52  ;;  %v153_v60 = vadd.f32 %v137_v57, %v128_v54  ;;  %v129_v8 = vadd.f32 %v112_v55, %v98_v38 }
  0xa8   :  { %v113_v62 = vrot.slane %v99_v56, 7  ;;  %v138_v63 = vrot.slane %v99_v56, 1  ;;  %v52_v4 = vpop.permute.xlu1 %51  ;;  %v79_v6 = vpop.permute.xlu0 %78  ;;  %v603_v7 = vsel %vm602_vm12, %v595_v44, %v600_v59 }
  0xa9   :  { %v65_v9 = vsel %vm59_vm6, 0.0, %v52_v4  ;;  %v94_v10 = vsel %vm90_vm7, %v79_v6, 0.0  ;;  %873 = vmatmul.mubr.msk.f32.vlgmr.msra.gmra.mrb[6].mxu0 %vm183_vm0, %v603_v7  ;;  %v159_v11 = vsub.f32 %v153_v60, %v997_v5 }
  0xaa   :  { %v114_v12 = vsel %vm109_vm8, %v111_v47, %v113_v62  ;;  %v139_v13 = vsel %vm134_vm10, %v136_v48, %v138_v63  ;;  %v71_v14 = vadd.f32 %v65_v9, %v1119_v40  ;;  %v100_v15 = vadd.f32 %v94_v10, %v69_v58 }
  0xab   :  { %v154_v16 = vadd.f32 %v139_v13, %v129_v8  ;;  %845 = vmatprep.mubr.msk.f32.mxu1 %vm183_vm0, %v159_v11  ;;  %v130_v24 = vadd.f32 %v114_v12, %v99_v56  ;;  %v435_v45 = vmul.f32 %v159_v11, %v997_v5 }
  0xac   :  { %v115_v20 = vrot.slane %v100_v15, 7  ;;  %v140_v21 = vrot.slane %v100_v15, 1  ;;  %v83_v22 = vpop.permute.xlu1 %82  ;;  %v81_v23 = vpop.permute.xlu0 %80 }
  0xad   :  { %v160_v25 = vsub.f32 %v154_v16, %v1072_v26  ;;  %v96_v27 = vsel %vm90_vm7, %v83_v22, 0.0  ;;  %v95_v28 = vsel %vm90_vm7, %v81_v23, 0.0  ;;  %v441_v55 = vsel %vm183_vm0, %v435_v45, 0.0 }
  0xae   :  { %v102_v30 = vadd.f32 %v96_v27, %v71_v14  ;;  %v101_v31 = vadd.f32 %v95_v28, %v70_v19  ;;  %v141_v32 = vsel %vm134_vm10, %v138_v63, %v140_v21  ;;  %v116_v33 = vsel %vm109_vm8, %v113_v62, %v115_v20 }
  0xaf   :  { %v436_v35 = vmul.f32 %v160_v25, %v1072_v26  ;;  %846 = vmatmul.mubr.msk.f32.vlgmr.msra.gmra.mrb[0].mxu1 %vm183_vm0, %v160_v25  ;;  %v155_v36 = vadd.f32 %v141_v32, %v130_v24  ;;  %v131_v44 = vadd.f32 %v116_v33, %v100_v15  ;;  %v683_v14 = vmul.f32 %v973_v0, %v973_v0 }
  0xb0   :  { %v119_v38 = vrot.slane %v102_v30, 7  ;;  %v144_v39 = vrot.slane %v102_v30, 1  ;;  %v117_v41 = vrot.slane %v101_v31, 7  ;;  %v142_v42 = vrot.slane %v101_v31, 1 }
  0xb1   :  { %v161_v43 = vsub.f32 %v155_v36, %v1086_v29  ;;  %v442_v50 = vsel %vm183_vm0, %v436_v35, 0.0  ;;  %v682_v16 = vmul.f32 %v1045_v18, %v1045_v18  ;;  %v685_v25 = vmul.f32 %v1040_v17, %v1040_v17 }
  0xb2   :  { %v118_v46 = vsel %vm109_vm8, %v115_v20, %v117_v41  ;;  %v120_v47 = vsel %vm109_vm8, %v117_v41, %v119_v38  ;;  %v143_v49 = vsel %vm134_vm10, %v140_v21, %v142_v42  ;;  %v145_v51 = vsel %vm134_vm10, %v142_v42, %v144_v39 }
  0xb3   :  { %v132_v48 = vadd.f32 %v118_v46, %v101_v31  ;;  %848 = vmatprep.mubr.msk.f32.mxu1 %vm183_vm0, %v161_v43  ;;  %v437_v26 = vmul.f32 %v161_v43, %v1086_v29  ;;  %v156_v52 = vadd.f32 %v143_v49, %v131_v44  ;;  %v133_v53 = vadd.f32 %v120_v47, %v102_v30 }
  0xb4   :  { %v152_v54 = vsel %vm134_vm10, %v144_v39, 0.0  ;;  %v443_v59 = vadd.f32 %v442_v50, %v441_v55 }
  0xb5   :  { %v157_v5 = vadd.f32 %v145_v51, %v132_v48  ;;  %v162_v56 = vsub.f32 %v156_v52, %v1098_v34  ;;  %v158_v57 = vadd.f32 %v152_v54, %v133_v53  ;;  %v444_v58 = vsel %vm183_vm0, %v437_v26, 0.0 }
  0xb6   :  { %v445_v63 = vadd.f32 %v444_v58, %v443_v59 }
  0xb7   :  { %v163_v29 = vsub.f32 %v157_v5, %v1110_v37  ;;  %849 = vmatmul.mubr.msk.f32.gmra.mrb[2].mxu1 %vm183_vm0, %v162_v56  ;;  %v164_v60 = vsub.f32 %v158_v57, %v1119_v40  ;;  %v438_v61 = vmul.f32 %v162_v56, %v1098_v34  ;;  %v681_v34 = vmul.f32 %v992_v3, %v992_v3 }
  0xb9   :  { %851 = vmatprep.mubr.msk.f32.mxu1 %vm183_vm0, %v163_v29  ;;  %v439_v62 = vmul.f32 %v163_v29, %v1110_v37  ;;  %v440_v4 = vmul.f32 %v164_v60, %v1119_v40  ;;  %v446_v6 = vsel %vm183_vm0, %v438_v61, 0.0  ;;  %v680_v37 = vmul.f32 %v978_v1, %v978_v1 }
  0xba   :  { %v447_v7 = vadd.f32 %v446_v6, %v445_v63  ;;  %v684_v1 = vmul.f32 %v987_v2, %v987_v2 }
  0xbb   :  { %v448_v8 = vsel %vm183_vm0, %v439_v62, 0.0  ;;  %852 = vmatmul.mubr.msk.f32.gmra.mrb[4].mxu1 %vm183_vm0, %v164_v60  ;;  %v450_v10 = vsel %vm183_vm0, %v440_v4, 0.0 }
  0xbc   :  { %v449_v9 = vadd.f32 %v448_v8, %v447_v7 }
  0xbe   :  { %v451_v11 = vadd.f32 %v450_v10, %v449_v9 }
  0xc0   :  { %452 = vadd.xlane.f32.xlu1 %v451_v11 }
  0xee   :  { %v820_v12 = vpop.f32.mrb[0].mxu0 }
  0xef   :  { %v687_v40 = vmul.f32 %v820_v12, %v681_v34  ;;  %v266_v13 = vpop.f32.mrb[1].mxu0 }
  0xf0   :  { %v686_v15 = vmul.f32 %v680_v37, %v266_v13 }
  0xf1   :  { %v693_v19 = vsel %vm414_vm3, %v687_v40, 0.0 }
  0xf2   :  { %v692_v20 = vsel %vm414_vm3, %v686_v15, 0.0  ;;  %v823_v21 = vpop.f32.mrb[2].mxu0 }
  0xf3   :  { %v694_v22 = vadd.f32 %v693_v19, %v692_v20  ;;  %v689_v3 = vmul.f32 %v823_v21, %v683_v14  ;;  %v276_v23 = vpop.f32.mrb[3].mxu0 }
  0xf4   :  { %v688_v24 = vmul.f32 %v682_v16, %v276_v23 }
  0xf5   :  { %v697_v18 = vsel %vm414_vm3, %v689_v3, 0.0 }
  0xf6   :  { %v695_v0 = vsel %vm414_vm3, %v688_v24, 0.0  ;;  %v826_v27 = vpop.f32.mrb[4].mxu0 }
  0xf7   :  { %v696_v28 = vadd.f32 %v695_v0, %v694_v22  ;;  %v286_v30 = vpop.f32.mrb[5].mxu0  ;;  %v691_v32 = vmul.f32 %v826_v27, %v685_v25 }
  0xf8   :  { %v690_v31 = vmul.f32 %v684_v1, %v286_v30 }
  0xf9   :  { %v698_v35 = vadd.f32 %v697_v18, %v696_v28  ;;  %v701_v38 = vsel %vm414_vm3, %v691_v32, 0.0 }
  0xfa   :  { %v699_v33 = vsel %vm414_vm3, %v690_v31, 0.0 }
  0xfb   :  { %v700_v36 = vadd.f32 %v699_v33, %v698_v35  ;;  %v733_v33 = vlaneseq }
  0xfd   :  { %v702_v39 = vadd.f32 %v701_v38, %v700_v36  ;;  %v734_v35 = vshrl.u32 %v733_v33, 7 }
  0xff   :  { %703 = vadd.xlane.f32.xlu0 %v702_v39  ;;  %vm735_vm14 = vcmp.eq.s32.totalorder %v734_v35, 0 }
 0x14d   :  { %v453_v8 = vpop.xlane.xlu1 %452 }
 0x14e   :  { %v454_v10 = vrot.slane %v453_v8, 4 }
 0x150   :  { %v455_v34 = vadd.f32 %v454_v10, %v453_v8 }
 0x17c   :  { %v676_v2 = vpop.f32.mrb[6].mxu0 }
 0x17d   :  { %v874_v41 = vpop.f32.mrb[7].mxu0  ;;  %v714_v17 = vrot.slane %v676_v2, 6  ;;  %v712_v57 = vmul.f32 %v676_v2, %v676_v2 }
 0x17f   :  { %935 = vrcp.f32 %v714_v17 }
 0x182   :  { %v847_v42 = vpop.f32.mrb[0].mxu1 }
 0x183   :  { %v409_v43 = vmul.f32 %v847_v42, %v820_v12  ;;  %v379_v44 = vpop.f32.mrb[1].mxu1  ;;  %v456_v12 = vrot.slane %v455_v34, 2 }
 0x184   :  { %v408_v45 = vmul.f32 %v379_v44, %v266_v13 }
 0x185   :  { %v416_v46 = vsel %vm414_vm3, %v409_v43, 0.0  ;;  %v457_v16 = vadd.f32 %v456_v12, %v455_v34 }
 0x186   :  { %v415_v47 = vsel %vm414_vm3, %v408_v45, 0.0 }
 0x187   :  { %v417_v48 = vadd.f32 %v416_v46, %v415_v47  ;;  %v458_v24 = vrot.slane %v457_v16, 1 }
 0x189   :  { %v936_v54 = vpop.eup %935  ;;  %v459_v28 = vadd.f32 %v458_v24, %v457_v16 }
 0x18a   :  { %v850_v26 = vpop.f32.mrb[2].mxu1  ;;  %v717_v61 = vmul.f32 %v936_v54, %v712_v57 }
 0x18b   :  { %v411_v49 = vmul.f32 %v850_v26, %v823_v21  ;;  %v389_v50 = vpop.f32.mrb[3].mxu1 }
 0x18c   :  { %v410_v51 = vmul.f32 %v389_v50, %v276_v23  ;;  %v719_v6 = vrot.slane %v717_v61, 2  ;;  %v704_v9 = vpop.xlane.xlu0 %703 }
 0x18d   :  { %v420_v58 = vsel %vm414_vm3, %v411_v49, 0.0  ;;  %v705_v11 = vrot.slane %v704_v9, 4 }
 0x18e   :  { %v418_v52 = vsel %vm414_vm3, %v410_v51, 0.0  ;;  %v853_v53 = vpop.f32.mrb[4].mxu1  ;;  %v722_v7 = vsel %vm721_vm13, %v719_v6, 0.0 }
 0x18f   :  { %v419_v5 = vadd.f32 %v418_v52, %v417_v48  ;;  %v413_v55 = vmul.f32 %v853_v53, %v826_v27  ;;  %v399_v56 = vpop.f32.mrb[5].mxu1  ;;  %v706_v37 = vadd.f32 %v705_v11, %v704_v9 }
 0x190   :  { %v412_v59 = vmul.f32 %v399_v56, %v286_v30 }
 0x191   :  { %v421_v29 = vadd.f32 %v420_v58, %v419_v5  ;;  %v424_v63 = vsel %vm414_vm3, %v413_v55, 0.0  ;;  %v707_v13 = vrot.slane %v706_v37, 2 }
 0x192   :  { %v422_v60 = vsel %vm414_vm3, %v412_v59, 0.0 }
 0x193   :  { %v423_v62 = vadd.f32 %v422_v60, %v421_v29  ;;  %v708_v22 = vadd.f32 %v707_v13, %v706_v37 }
 0x195   :  { %v425_v4 = vadd.f32 %v424_v63, %v423_v62  ;;  %v709_v0 = vrot.slane %v708_v22, 1 }
 0x197   :  { %426 = vadd.xlane.f32.xlu0 %v425_v4  ;;  %v710_v30 = vadd.f32 %v709_v0, %v708_v22 }
 0x19b   :  { %723 = vadd.xlane.f32.xlu0 %v722_v7 }
 0x224   :  { %v427_v40 = vpop.xlane.xlu0 %426 }
 0x225   :  { %v428_v14 = vrot.slane %v427_v40, 4 }
 0x227   :  { %v429_v15 = vadd.f32 %v428_v14, %v427_v40 }
 0x228   :  { %v724_v19 = vpop.xlane.xlu0 %723 }
 0x229   :  { %v430_v20 = vrot.slane %v429_v15, 2  ;;  %v725_v21 = vrot.slane %v724_v19, 4 }
 0x22b   :  { %v726_v3 = vadd.f32 %v725_v21, %v724_v19  ;;  %v431_v23 = vadd.f32 %v430_v20, %v429_v15 }
 0x22d   :  { %v727_v1 = vrot.slane %v726_v3, 2  ;;  %v432_v25 = vrot.slane %v431_v23, 1 }
 0x22f   :  { %v728_v27 = vadd.f32 %v727_v1, %v726_v3  ;;  %v433_v18 = vadd.f32 %v432_v25, %v431_v23 }
 0x231   :  { %919 = vpush %v433_v18  ;;  %v729_v31 = vrot.slane %v728_v27, 1 }
 0x232   :  { %921 = vpush %v459_v28 }
 0x233   :  { %923 = vpush %v710_v30  ;;  %v730_v32 = vadd.f32 %v729_v31, %v728_v27 }
 0x235   :  { %925 = vpush %v730_v32 }
 0x262   :  { %s920_s3 = spop %919 }
 0x263   :  { %s922_s25 = spop %921 }
 0x264   :  { %s461_s26 = ssub.f32 %s920_s3, %s922_s25  ;;  %s924_s27 = spop %923 }
 0x266   :  { %s926_s19 = spop %925  ;;  %v737_v36 = vstv %s461_s26 }
 0x267   :  { %s732_s2 = ssub.f32 %s924_s27, %s926_s19 }
 0x269   :  { %v736_v38 = vstv %s732_s2 }
 0x26a   :  { %v738_v39 = vsel %vm735_vm14, %v736_v38, %v737_v36 }
 0x26b   :  { %739 = vst [vmem:[%s1285_s4] sm:$0xff] %v738_v39 }

</bundles_post_ra>
